<compile_context>
chip_gen: v6e
topology: v6e:2x2x1
jax: 0.10.0
libtpu: 0.0.40
codegen_flags: <defaults>
</compile_context>

<pallas_src>
import functools

import jax
import jax.numpy as jnp
from jax.experimental import pallas as pl
from jax.experimental.pallas import tpu as pltpu


def _round_up(x, m):
    return ((x + m - 1) // m) * m


def _autoencoder_kernel(x_ref,
                        w1_ref, b1_ref,
                        w2_ref, b2_ref,
                        w3_ref, b3_ref,
                        w4_ref, b4_ref,
                        enc_ref, dec_ref):
    """Four fused Linear+ReLU layers: MXU matmuls (f32 accumulation) + VPU ReLU."""
    compute_dtype = x_ref.dtype
    x = x_ref[...]

    # --- encoder ---
    h1 = jnp.dot(x, w1_ref[...], preferred_element_type=jnp.float32) + b1_ref[...]
    h1 = jnp.maximum(h1, 0.0)
    enc = jnp.dot(h1.astype(compute_dtype), w2_ref[...],
                  preferred_element_type=jnp.float32) + b2_ref[...]
    enc = jnp.maximum(enc, 0.0)

    # --- decoder ---
    h3 = jnp.dot(enc.astype(compute_dtype), w3_ref[...],
                 preferred_element_type=jnp.float32) + b3_ref[...]
    h3 = jnp.maximum(h3, 0.0)
    dec = jnp.dot(h3.astype(compute_dtype), w4_ref[...],
                  preferred_element_type=jnp.float32) + b4_ref[...]
    dec = jnp.maximum(dec, 0.0)

    enc_ref[...] = enc.astype(enc_ref.dtype)
    dec_ref[...] = dec.astype(dec_ref.dtype)


@functools.partial(jax.jit, static_argnames=("block_b", "compute_dtype"))
def anime_autoencoder_forward(x, params, *, block_b=256, compute_dtype=jnp.bfloat16):
    """Pallas-backed forward pass. Returns (encoded, decoded) in float32."""
    w1, b1, w2, b2, w3, b3, w4, b4 = params
    B, input_dim = x.shape
    hidden = w1.shape[1]            # encoding_dim
    enc_half = w2.shape[1]          # encoding_dim // 2

    # ---- pad every feature dim to a multiple of 128 (exact; see header) ----
    in_pad = max(_round_up(input_dim, 128), 128)
    hid_pad = max(_round_up(hidden, 128), 128)
    enc_pad = max(_round_up(enc_half, 128), 128)

    if in_pad != input_dim:
        x = jnp.pad(x, ((0, 0), (0, in_pad - input_dim)))
        w1 = jnp.pad(w1, ((0, in_pad - input_dim), (0, 0)))        # zero rows
        w4 = jnp.pad(w4, ((0, 0), (0, in_pad - input_dim)))        # zero cols
        b4 = jnp.pad(b4, ((0, 0), (0, in_pad - input_dim)))
    if hid_pad != hidden:
        w1 = jnp.pad(w1, ((0, 0), (0, hid_pad - hidden)))
        b1 = jnp.pad(b1, ((0, 0), (0, hid_pad - hidden)))
        w2 = jnp.pad(w2, ((0, hid_pad - hidden), (0, 0)))
        w3 = jnp.pad(w3, ((0, 0), (0, hid_pad - hidden)))
        b3 = jnp.pad(b3, ((0, 0), (0, hid_pad - hidden)))
        w4 = jnp.pad(w4, ((0, hid_pad - hidden), (0, 0)))
    if enc_pad != enc_half:
        w2 = jnp.pad(w2, ((0, 0), (0, enc_pad - enc_half)))
        b2 = jnp.pad(b2, ((0, 0), (0, enc_pad - enc_half)))
        w3 = jnp.pad(w3, ((0, enc_pad - enc_half), (0, 0)))

    # ---- batch tiling: zero-padded rows are exact (row-wise network) ----
    eff_block = min(block_b, _round_up(B, 8))
    B_pad = _round_up(B, eff_block)
    if B_pad != B:
        x = jnp.pad(x, ((0, B_pad - B), (0, 0)))

    # Matmul operands in compute_dtype (bf16 default: higher MXU throughput,
    # half the HBM bytes); biases + accumulation stay f32.
    x_c = x.astype(compute_dtype)
    w1c, w2c, w3c, w4c = (w.astype(compute_dtype) for w in (w1, w2, w3, w4))
    b1f, b2f, b3f, b4f = (b.astype(jnp.float32) for b in (b1, b2, b3, b4))

    grid = (B_pad // eff_block,)

    x_spec = pl.BlockSpec((eff_block, in_pad), lambda i: (i, 0))

    def full_spec(shape):
        # Constant index_map -> weights/biases stay resident across the grid.
        return pl.BlockSpec(shape, lambda i: tuple(0 for _ in shape))

    in_specs = [
        x_spec,
        full_spec(w1c.shape), full_spec(b1f.shape),
        full_spec(w2c.shape), full_spec(b2f.shape),
        full_spec(w3c.shape), full_spec(b3f.shape),
        full_spec(w4c.shape), full_spec(b4f.shape),
    ]
    out_specs = [
        pl.BlockSpec((eff_block, enc_pad), lambda i: (i, 0)),
        pl.BlockSpec((eff_block, in_pad), lambda i: (i, 0)),
    ]
    out_shape = [
        jax.ShapeDtypeStruct((B_pad, enc_pad), jnp.float32),
        jax.ShapeDtypeStruct((B_pad, in_pad), jnp.float32),
    ]

    encoded, decoded = pl.pallas_call(
        _autoencoder_kernel,
        grid=grid,
        in_specs=in_specs,
        out_specs=out_specs,
        out_shape=out_shape,
        compiler_params=pltpu.CompilerParams(
            dimension_semantics=("parallel",),          # batch tiles shard across v7x's 2 TCs
            vmem_limit_bytes=64 * 1024 * 1024,          # headroom for big tiles / large input_dim
        ),
    )(x_c, w1c, b1f, w2c, b2f, w3c, b3f, w4c, b4f)

    # Slice off batch padding and padded feature columns.
    return encoded[:B, :enc_half], decoded[:B, :input_dim]


def init_params(key, input_dim, encoding_dim):
    """Deterministic init mirroring nn.Linear shapes (stored as (in, out) + (1, out))."""
    enc_half = encoding_dim // 2
    dims = [
        (input_dim, encoding_dim),   # encoder layer 1
        (encoding_dim, enc_half),    # encoder layer 2
        (enc_half, encoding_dim),    # decoder layer 1
        (encoding_dim, input_dim),   # decoder layer 2
    ]
    params = []
    for (fan_in, fan_out) in dims:
        key, kw, kb = jax.random.split(key, 3)
        bound = 1.0 / jnp.sqrt(jnp.float32(fan_in))
        w = jax.random.uniform(kw, (fan_in, fan_out), jnp.float32, -bound, bound)
        b = jax.random.uniform(kb, (1, fan_out), jnp.float32, -bound, bound)
        params += [w, b]
    return tuple(params)


def _reference_forward(x, params, compute_dtype):
    """Pure-JAX reference with the same mixed-precision policy as the kernel."""
    w1, b1, w2, b2, w3, b3, w4, b4 = params

    def layer(h, w, b):
        y = jnp.dot(h.astype(compute_dtype), w.astype(compute_dtype),
                    preferred_element_type=jnp.float32) + b.astype(jnp.float32)
        return jnp.maximum(y, 0.0)

    h1 = layer(x, w1, b1)
    enc = layer(h1, w2, b2)
    h3 = layer(enc, w3, b3)
    dec = layer(h3, w4, b4)
    return enc, dec


if __name__ == "__main__":
    # Small synthetic shapes consistent with the module:
    # feature vector (tfidf + genres + score) stands in as input_dim=256.
    batch = 8
    input_dim = 256
    encoding_dim = 128

    key = jax.random.PRNGKey(0)
    key, kx = jax.random.split(key)
    x = jax.random.uniform(kx, (batch, input_dim), jnp.float32)
    params = init_params(key, input_dim, encoding_dim)

    # 1) Exact-precision path (f32 operands) vs pure-f32 reference.
    enc32, dec32 = anime_autoencoder_forward(x, params, compute_dtype=jnp.float32)
    jax.block_until_ready((enc32, dec32))
    enc_ref, dec_ref = _reference_forward(x, params, jnp.float32)
    assert enc32.shape == (batch, encoding_dim // 2)
    assert dec32.shape == (batch, input_dim)
    assert jnp.allclose(enc32, enc_ref, atol=1e-5, rtol=1e-5)
    assert jnp.allclose(dec32, dec_ref, atol=1e-5, rtol=1e-5)

    # 2) Default fast path (bf16 operands, f32 accumulation) on a ragged batch
    #    (exercises the padded last tile) vs the matching mixed-precision reference.
    xr = jax.random.uniform(jax.random.PRNGKey(1), (13, input_dim), jnp.float32)
    enc_bf, dec_bf = anime_autoencoder_forward(xr, params)
    jax.block_until_ready((enc_bf, dec_bf))
    enc_refb, dec_refb = _reference_forward(xr, params, jnp.bfloat16)
    assert enc_bf.shape == (13, encoding_dim // 2)
    assert dec_bf.shape == (13, input_dim)
    assert jnp.allclose(enc_bf, enc_refb, atol=2e-2, rtol=2e-2)
    assert jnp.allclose(dec_bf, dec_refb, atol=2e-2, rtol=2e-2)

    # 3) Non-128-aligned feature dims (exercises input/hidden/bottleneck padding).
    in_dim_r, enc_dim_r = 200, 96
    xo = jax.random.uniform(jax.random.PRNGKey(2), (5, in_dim_r), jnp.float32)
    params_r = init_params(jax.random.PRNGKey(3), in_dim_r, enc_dim_r)
    enc_o, dec_o = anime_autoencoder_forward(xo, params_r, compute_dtype=jnp.float32)
    jax.block_until_ready((enc_o, dec_o))
    enc_refo, dec_refo = _reference_forward(xo, params_r, jnp.float32)
    assert enc_o.shape == (5, enc_dim_r // 2)
    assert dec_o.shape == (5, in_dim_r)
    assert jnp.allclose(enc_o, enc_refo, atol=1e-5, rtol=1e-5)
    assert jnp.allclose(dec_o, dec_refo, atol=1e-5, rtol=1e-5)

    print("KERNEL_OK")
</pallas_src>

<mosaic_0001>
module attributes {stable_mosaic.version = 11 : i64} {
  func.func @_autoencoder_kernel(%arg0: i32, %arg1: memref<8x256xf32, #tpu.memory_space<vmem>>, %arg2: memref<256x128xf32, #tpu.memory_space<vmem>>, %arg3: memref<1x128xf32, #tpu.memory_space<vmem>>, %arg4: memref<128x128xf32, #tpu.memory_space<vmem>>, %arg5: memref<1x128xf32, #tpu.memory_space<vmem>>, %arg6: memref<128x128xf32, #tpu.memory_space<vmem>>, %arg7: memref<1x128xf32, #tpu.memory_space<vmem>>, %arg8: memref<128x256xf32, #tpu.memory_space<vmem>>, %arg9: memref<1x256xf32, #tpu.memory_space<vmem>>, %arg10: memref<8x128xf32, #tpu.memory_space<vmem>>, %arg11: memref<8x256xf32, #tpu.memory_space<vmem>>) attributes {dimension_semantics = [#tpu.dimension_semantics<parallel>], iteration_bounds = array<i64: 1>, scalar_prefetch = 0 : i64, scratch_operands = 0 : i64, tpu.core_type = #tpu.core_type<tc>, window_params = [{transform_indices = @transform_0, window_bounds = array<i64: 8, 256>}, {pipeline_mode = #tpu.pipeline_mode<synchronous>, transform_indices = @transform_1, window_bounds = array<i64: 256, 128>}, {pipeline_mode = #tpu.pipeline_mode<synchronous>, transform_indices = @transform_2, window_bounds = array<i64: 1, 128>}, {pipeline_mode = #tpu.pipeline_mode<synchronous>, transform_indices = @transform_3, window_bounds = array<i64: 128, 128>}, {pipeline_mode = #tpu.pipeline_mode<synchronous>, transform_indices = @transform_4, window_bounds = array<i64: 1, 128>}, {pipeline_mode = #tpu.pipeline_mode<synchronous>, transform_indices = @transform_5, window_bounds = array<i64: 128, 128>}, {pipeline_mode = #tpu.pipeline_mode<synchronous>, transform_indices = @transform_6, window_bounds = array<i64: 1, 128>}, {pipeline_mode = #tpu.pipeline_mode<synchronous>, transform_indices = @transform_7, window_bounds = array<i64: 128, 256>}, {pipeline_mode = #tpu.pipeline_mode<synchronous>, transform_indices = @transform_8, window_bounds = array<i64: 1, 256>}, {transform_indices = @transform_9, window_bounds = array<i64: 8, 128>}, {transform_indices = @transform_10, window_bounds = array<i64: 8, 256>}]} {
    %c0 = arith.constant 0 : index
    %c0_0 = arith.constant 0 : index
    %0 = vector.load %arg1[%c0, %c0_0] : memref<8x256xf32, #tpu.memory_space<vmem>>, vector<8x256xf32>
    %c0_1 = arith.constant 0 : index
    %c0_2 = arith.constant 0 : index
    %1 = vector.load %arg2[%c0_1, %c0_2] : memref<256x128xf32, #tpu.memory_space<vmem>>, vector<256x128xf32>
    %cst = arith.constant dense<0.000000e+00> : vector<8x128xf32>
    %2 = tpu.matmul %0, %1, %cst {dimension_numbers = #tpu.dot_dimension_numbers<[1], [0], [0], [1], [0, 0, 1, 1], [], []>} : vector<8x256xf32>, vector<256x128xf32>, vector<8x128xf32> -> vector<8x128xf32>
    %c0_3 = arith.constant 0 : index
    %c0_4 = arith.constant 0 : index
    %3 = vector.load %arg3[%c0_3, %c0_4] : memref<1x128xf32, #tpu.memory_space<vmem>>, vector<1x128xf32>
    %4 = vector.broadcast %3 : vector<1x128xf32> to vector<8x128xf32>
    %5 = arith.addf %2, %4 : vector<8x128xf32>
    %cst_5 = arith.constant 0.000000e+00 : f32
    %6 = vector.broadcast %cst_5 : f32 to vector<8x128xf32>
    %7 = arith.maximumf %5, %6 : vector<8x128xf32>
    %c0_6 = arith.constant 0 : index
    %c0_7 = arith.constant 0 : index
    %8 = vector.load %arg4[%c0_6, %c0_7] : memref<128x128xf32, #tpu.memory_space<vmem>>, vector<128x128xf32>
    %cst_8 = arith.constant dense<0.000000e+00> : vector<8x128xf32>
    %9 = tpu.matmul %7, %8, %cst_8 {dimension_numbers = #tpu.dot_dimension_numbers<[1], [0], [0], [1], [0, 0, 1, 1], [], []>} : vector<8x128xf32>, vector<128x128xf32>, vector<8x128xf32> -> vector<8x128xf32>
    %c0_9 = arith.constant 0 : index
    %c0_10 = arith.constant 0 : index
    %10 = vector.load %arg5[%c0_9, %c0_10] : memref<1x128xf32, #tpu.memory_space<vmem>>, vector<1x128xf32>
    %11 = vector.broadcast %10 : vector<1x128xf32> to vector<8x128xf32>
    %12 = arith.addf %9, %11 : vector<8x128xf32>
    %cst_11 = arith.constant 0.000000e+00 : f32
    %13 = vector.broadcast %cst_11 : f32 to vector<8x128xf32>
    %14 = arith.maximumf %12, %13 : vector<8x128xf32>
    %c0_12 = arith.constant 0 : index
    %c0_13 = arith.constant 0 : index
    %15 = vector.load %arg6[%c0_12, %c0_13] : memref<128x128xf32, #tpu.memory_space<vmem>>, vector<128x128xf32>
    %cst_14 = arith.constant dense<0.000000e+00> : vector<8x128xf32>
    %16 = tpu.matmul %14, %15, %cst_14 {dimension_numbers = #tpu.dot_dimension_numbers<[1], [0], [0], [1], [0, 0, 1, 1], [], []>} : vector<8x128xf32>, vector<128x128xf32>, vector<8x128xf32> -> vector<8x128xf32>
    %c0_15 = arith.constant 0 : index
    %c0_16 = arith.constant 0 : index
    %17 = vector.load %arg7[%c0_15, %c0_16] : memref<1x128xf32, #tpu.memory_space<vmem>>, vector<1x128xf32>
    %18 = vector.broadcast %17 : vector<1x128xf32> to vector<8x128xf32>
    %19 = arith.addf %16, %18 : vector<8x128xf32>
    %cst_17 = arith.constant 0.000000e+00 : f32
    %20 = vector.broadcast %cst_17 : f32 to vector<8x128xf32>
    %21 = arith.maximumf %19, %20 : vector<8x128xf32>
    %c0_18 = arith.constant 0 : index
    %c0_19 = arith.constant 0 : index
    %22 = vector.load %arg8[%c0_18, %c0_19] : memref<128x256xf32, #tpu.memory_space<vmem>>, vector<128x256xf32>
    %cst_20 = arith.constant dense<0.000000e+00> : vector<8x256xf32>
    %23 = tpu.matmul %21, %22, %cst_20 {dimension_numbers = #tpu.dot_dimension_numbers<[1], [0], [0], [1], [0, 0, 1, 1], [], []>} : vector<8x128xf32>, vector<128x256xf32>, vector<8x256xf32> -> vector<8x256xf32>
    %c0_21 = arith.constant 0 : index
    %c0_22 = arith.constant 0 : index
    %24 = vector.load %arg9[%c0_21, %c0_22] : memref<1x256xf32, #tpu.memory_space<vmem>>, vector<1x256xf32>
    %25 = vector.broadcast %24 : vector<1x256xf32> to vector<8x256xf32>
    %26 = arith.addf %23, %25 : vector<8x256xf32>
    %cst_23 = arith.constant 0.000000e+00 : f32
    %27 = vector.broadcast %cst_23 : f32 to vector<8x256xf32>
    %28 = arith.maximumf %26, %27 : vector<8x256xf32>
    %c0_24 = arith.constant 0 : index
    %c0_25 = arith.constant 0 : index
    %29 = vector.load %arg10[%c0_24, %c0_25] : memref<8x128xf32, #tpu.memory_space<vmem>>, vector<8x128xf32>
    tpu.vector_store %arg10[%c0_24, %c0_25], %14 {strides = array<i32>} : memref<8x128xf32, #tpu.memory_space<vmem>>, vector<8x128xf32>,
    %c0_26 = arith.constant 0 : index
    %c0_27 = arith.constant 0 : index
    %30 = vector.load %arg11[%c0_26, %c0_27] : memref<8x256xf32, #tpu.memory_space<vmem>>, vector<8x256xf32>
    tpu.vector_store %arg11[%c0_26, %c0_27], %28 {strides = array<i32>} : memref<8x256xf32, #tpu.memory_space<vmem>>, vector<8x256xf32>,
    return
  }
  func.func @transform_0(%arg0: i32) -> (i32, i32) {
    %c0_i32 = arith.constant 0 : i32
    %c0_i32_0 = arith.constant 0 : i32
    return %arg0, %c0_i32 : i32, i32
  }
  func.func @transform_1(%arg0: i32) -> (i32, i32) {
    %c0_i32 = arith.constant 0 : i32
    %c0_i32_0 = arith.constant 0 : i32
    %c0_i32_1 = arith.constant 0 : i32
    return %c0_i32, %c0_i32_0 : i32, i32
  }
  func.func @transform_2(%arg0: i32) -> (i32, i32) {
    %c0_i32 = arith.constant 0 : i32
    %c0_i32_0 = arith.constant 0 : i32
    %c0_i32_1 = arith.constant 0 : i32
    return %c0_i32, %c0_i32_0 : i32, i32
  }
  func.func @transform_3(%arg0: i32) -> (i32, i32) {
    %c0_i32 = arith.constant 0 : i32
    %c0_i32_0 = arith.constant 0 : i32
    %c0_i32_1 = arith.constant 0 : i32
    return %c0_i32, %c0_i32_0 : i32, i32
  }
  func.func @transform_4(%arg0: i32) -> (i32, i32) {
    %c0_i32 = arith.constant 0 : i32
    %c0_i32_0 = arith.constant 0 : i32
    %c0_i32_1 = arith.constant 0 : i32
    return %c0_i32, %c0_i32_0 : i32, i32
  }
  func.func @transform_5(%arg0: i32) -> (i32, i32) {
    %c0_i32 = arith.constant 0 : i32
    %c0_i32_0 = arith.constant 0 : i32
    %c0_i32_1 = arith.constant 0 : i32
    return %c0_i32, %c0_i32_0 : i32, i32
  }
  func.func @transform_6(%arg0: i32) -> (i32, i32) {
    %c0_i32 = arith.constant 0 : i32
    %c0_i32_0 = arith.constant 0 : i32
    %c0_i32_1 = arith.constant 0 : i32
    return %c0_i32, %c0_i32_0 : i32, i32
  }
  func.func @transform_7(%arg0: i32) -> (i32, i32) {
    %c0_i32 = arith.constant 0 : i32
    %c0_i32_0 = arith.constant 0 : i32
    %c0_i32_1 = arith.constant 0 : i32
    return %c0_i32, %c0_i32_0 : i32, i32
  }
  func.func @transform_8(%arg0: i32) -> (i32, i32) {
    %c0_i32 = arith.constant 0 : i32
    %c0_i32_0 = arith.constant 0 : i32
    %c0_i32_1 = arith.constant 0 : i32
    return %c0_i32, %c0_i32_0 : i32, i32
  }
  func.func @transform_9(%arg0: i32) -> (i32, i32) {
    %c0_i32 = arith.constant 0 : i32
    %c0_i32_0 = arith.constant 0 : i32
    return %arg0, %c0_i32 : i32, i32
  }
  func.func @transform_10(%arg0: i32) -> (i32, i32) {
    %c0_i32 = arith.constant 0 : i32
    %c0_i32_0 = arith.constant 0 : i32
    return %arg0, %c0_i32 : i32, i32
  }
}

</mosaic_0001>

<bundles_post_ra>
// kernel: anime_autoencoder_forward.1
= control target key start
LH: loop header
LB: loop body
LE: loop exit
PB: predicated region body
PF: predicated region fallthrough
CT: control target
= control target key end

     0   :  { %16 = vsyncpa [#allocation3], 0  ;;  %v674_v4 = vmov 0.0   ;;  %s1080_s0 = inlined_call_operand.vmem [shape: f32[8,256], index: 0, kind: input, shape index: {}]   ;;  %s1081_s1 = inlined_call_operand.vmem [shape: f32[256,128], index: 1, kind: input, shape index: {}]   ;;  %s1082_s2 = inlined_call_operand.vmem [shape: f32[1,128], index: 2, kind: input, shape index: {}]   ;;  %s1083_s3 = inlined_call_operand.vmem [shape: f32[128,128], index: 3, kind: input, shape index: {}]   ;;  %s1084_s4 = inlined_call_operand.vmem [shape: f32[1,128], index: 4, kind: input, shape index: {}]   ;;  %s1085_s5 = inlined_call_operand.vmem [shape: f32[128,128], index: 5, kind: input, shape index: {}]   ;;  %s1086_s6 = inlined_call_operand.vmem [shape: f32[1,128], index: 6, kind: input, shape index: {}]   ;;  %s1087_s7 = inlined_call_operand.vmem [shape: f32[128,256], index: 7, kind: input, shape index: {}]   ;;  %s1088_s8 = inlined_call_operand.vmem [shape: f32[1,256], index: 8, kind: input, shape index: {}]   ;;  %s1089_s9 = inlined_call_operand.hbm [shape: f32[8,128], index: 9, kind: output, shape index: {0}]   ;;  %s1090_s10 = inlined_call_operand.hbm [shape: f32[8,256], index: 10, kind: output, shape index: {1}]  }
   0x1   :  { %v69_v0 = vld [vmem:[%s1081_s1 + $0xf8] sm:$0xff]  ;;  %v68_v2 = vld [vmem:[%s1081_s1 + $0xf0] sm:$0xff]  ;;  %556 = vmatprep.subr.mxu1 %v674_v4  ;;  %v67_v5 = vld [vmem:[%s1081_s1 + $0xe8] sm:$0xff] }
   0x2   :  { %v53_v1 = vld [vmem:[%s1081_s1 + $0x78] sm:$0xff]  ;;  %487 = vmatprep.subr.mxu0 %v69_v0  ;;  %v52_v3 = vld [vmem:[%s1081_s1 + $0x70] sm:$0xff]  ;;  %v51_v6 = vld [vmem:[%s1081_s1 + $0x68] sm:$0xff] }
   0x3   :  { %488 = vmatpush3.msra.mxu0 %v53_v1  ;;  %v66_v7 = vld [vmem:[%s1081_s1 + $0xe0] sm:$0xff]  ;;  %v65_v9 = vld [vmem:[%s1081_s1 + $0xd8] sm:$0xff]  ;;  %v64_v11 = vld [vmem:[%s1081_s1 + $0xd0] sm:$0xff] }
   0x4   :  { %489 = vmatprep.subr.mxu0 %v68_v2  ;;  %v50_v8 = vld [vmem:[%s1081_s1 + $0x60] sm:$0xff]  ;;  %v49_v10 = vld [vmem:[%s1081_s1 + $0x58] sm:$0xff]  ;;  %v48_v12 = vld [vmem:[%s1081_s1 + $0x50] sm:$0xff] }
   0x5   :  { %490 = vmatpush3.msra.mxu0 %v52_v3  ;;  %v63_v13 = vld [vmem:[%s1081_s1 + $0xc8] sm:$0xff]  ;;  %v163_v16 = vld [vmem:[%s1083_s3 + $0x78] sm:$0xff]  ;;  %v162_v17 = vld [vmem:[%s1083_s3 + $0x70] sm:$0xff] }
   0x6   :  { %491 = vmatprep.subr.mxu0 %v67_v5  ;;  %v37_v14 = vld [vmem:[%s1080_s0 + $0x8] sm:$0xff]  ;;  %v62_v18 = vld [vmem:[%s1081_s1 + $0xc0] sm:$0xff]  ;;  %557 = vmatpush3.msra.mxu1 %v163_v16  ;;  %v61_v21 = vld [vmem:[%s1081_s1 + $0xb8] sm:$0xff] }
   0x7   :  { %492 = vmatpush3.msra.mxu0 %v51_v6  ;;  %v47_v15 = vld [vmem:[%s1081_s1 + $0x48] sm:$0xff]  ;;  %141 = vmatprep.mubr.f32.mxu0 %v37_v14  ;;  %v46_v19 = vld [vmem:[%s1081_s1 + $0x40] sm:$0xff]  ;;  %v45_v22 = vld [vmem:[%s1081_s1 + $0x38] sm:$0xff] }
   0x8   :  { %493 = vmatprep.subr.mxu0 %v66_v7  ;;  %558 = vmatprep.subr.mxu1 %v674_v4  ;;  %v161_v20 = vld [vmem:[%s1083_s3 + $0x68] sm:$0xff]  ;;  %v160_v23 = vld [vmem:[%s1083_s3 + $0x60] sm:$0xff] }
   0x9   :  { %494 = vmatpush3.msra.mxu0 %v50_v8  ;;  %559 = vmatpush3.msra.mxu1 %v162_v17 }
   0xa   :  { %495 = vmatprep.subr.mxu0 %v65_v9  ;;  %560 = vmatprep.subr.mxu1 %v674_v4 }
   0xb   :  { %496 = vmatpush3.msra.mxu0 %v49_v10 }
   0xc   :  { %497 = vmatprep.subr.mxu0 %v64_v11 }
   0xd   :  { %498 = vmatpush3.msra.mxu0 %v48_v12 }
   0xe   :  { %499 = vmatprep.subr.mxu0 %v63_v13 }
   0xf   :  { %500 = vmatpush3.msra.mxu0 %v47_v15 }
  0x10   :  { %501 = vmatprep.subr.mxu0 %v62_v18 }
  0x11   :  { %17 = vsyncpa [#allocation5], 0  ;;  %502 = vmatpush3.msra.mxu0 %v46_v19  ;;  %v60_v24 = vld [vmem:[%s1081_s1 + $0xb0] sm:$0xff]  ;;  %561 = vmatpush3.msra.mxu1 %v161_v20  ;;  %v159_v26 = vld [vmem:[%s1083_s3 + $0x58] sm:$0xff]  ;;  %vm675_vm0 = vmmov 0   ;;  %s676_s14 = smov [#allocation2]  }
  0x12   :  { %503 = vmatprep.subr.mxu0 %v61_v21  ;;  %v44_v25 = vld [vmem:[%s1081_s1 + $0x30] sm:$0xff]  ;;  %562 = vmatprep.subr.mxu1 %v674_v4  ;;  %v59_v27 = vld [vmem:[%s1081_s1 + $0xa8] sm:$0xff]  ;;  %v58_v30 = vld [vmem:[%s1081_s1 + $0xa0] sm:$0xff]  ;;  %s462_s15 = sshll.u32 %s676_s14, 4  ;;  %s463_s15 = int_to_ptr.vmem [resolvable:$true] %s462_s15 }
  0x13   :  { %504 = vmatpush3.msra.mxu0 %v45_v22  ;;  %563 = vmatpush3.msra.mxu1 %v160_v23  ;;  %v43_v28 = vld [vmem:[%s1081_s1 + $0x28] sm:$0xff]  ;;  %v158_v29 = vld [vmem:[%s1083_s3 + $0x50] sm:$0xff]  ;;  %v42_v31 = vld [vmem:[%s1081_s1 + $0x20] sm:$0xff]  ;;  %s630_s16 = scalar_lea.vmem %s463_s15, 128  ;;  %p635_p1 = scmp.lt.s32.totalorder %s463_s15, %s463_s15 }
  0x14   :  { %505 = vmatprep.subr.mxu0 %v60_v24  ;;  %564 = vmatprep.subr.mxu1 %v674_v4  ;;  %v157_v32 = vld [vmem:[%s1083_s3 + $0x48] sm:$0xff]  ;;  %v57_v33 = vld [vmem:[%s1081_s1 + $0x98] sm:$0xff]  ;;  %v156_v35 = vld [vmem:[%s1083_s3 + $0x40] sm:$0xff]  ;;  %p631_p0 = scmp.ne.s32.totalorder %s463_s15, %s630_s16  ;;  %p636_p2 = scmp.lt.s32.totalorder %s630_s16, %s630_s16 }
  0x15   :  { %506 = vmatpush3.msra.mxu0 %v44_v25  ;;  %565 = vmatpush3.msra.mxu1 %v159_v26  ;;  %v41_v34 = vld [vmem:[%s1081_s1 + $0x18] sm:$0xff]  ;;  %v56_v36 = vld [vmem:[%s1081_s1 + $0x90] sm:$0xff]  ;;  %v55_v39 = vld [vmem:[%s1081_s1 + $0x88] sm:$0xff] }
  0x16   :  { %507 = vmatprep.subr.mxu0 %v59_v27  ;;  %566 = vmatprep.subr.mxu1 %v674_v4  ;;  %v40_v37 = vld [vmem:[%s1081_s1 + $0x10] sm:$0xff]  ;;  %v155_v38 = vld [vmem:[%s1083_s3 + $0x38] sm:$0xff]  ;;  %v39_v40 = vld [vmem:[%s1081_s1 + $0x8] sm:$0xff]  ;;  %p637_p3 = por %p636_p2, %p635_p1 }
  0x17   :  { %508 = vmatpush3.msra.mxu0 %v43_v28  ;;  %567 = vmatpush3.msra.mxu1 %v158_v29  ;;  %v154_v41 = vld [vmem:[%s1083_s3 + $0x30] sm:$0xff]  ;;  %v54_v42 = vld [vmem:[%s1081_s1 + $0x80] sm:$0xff]  ;;  %v153_v44 = vld [vmem:[%s1083_s3 + $0x28] sm:$0xff] }
  0x18   :  { %509 = vmatprep.subr.mxu0 %v58_v30  ;;  %568 = vmatprep.subr.mxu1 %v674_v4  ;;  %v38_v43 = vld [vmem:[%s1081_s1] sm:$0xff]  ;;  %v151_v47 = vld [vmem:[%s1083_s3 + $0x18] sm:$0xff]  ;;  %v150_v48 = vld [vmem:[%s1083_s3 + $0x10] sm:$0xff]  ;;  %p638_p4 = pnand %p637_p3, %p631_p0 }
  0x19   :  { %510 = vmatpush3.msra.mxu0 %v42_v31  ;;  %569 = vmatpush3.msra.mxu1 %v157_v32  ;;  %v36_v45 = vld [vmem:[%s1080_s0] sm:$0xff]  ;;  %v149_v49 = vld [vmem:[%s1083_s3 + $0x8] sm:$0xff]  ;;  %v257_v51 = vld [vmem:[%s1085_s5 + $0x78] sm:$0xff] }
  0x1a   :  { %511 = vmatprep.subr.mxu0 %v57_v33  ;;  %570 = vmatprep.subr.mxu1 %v674_v4  ;;  %v152_v46 = vld [vmem:[%s1083_s3 + $0x20] sm:$0xff]  ;;  %v256_v52 = vld [vmem:[%s1085_s5 + $0x70] sm:$0xff]  ;;  %v255_v53 = vld [vmem:[%s1085_s5 + $0x68] sm:$0xff] }
  0x1b   :  { %512 = vmatpush3.msra.mxu0 %v41_v34  ;;  %571 = vmatpush3.msra.mxu1 %v156_v35  ;;  %v148_v50 = vld [vmem:[%s1083_s3] sm:$0xff]  ;;  %v253_v55 = vld [vmem:[%s1085_s5 + $0x58] sm:$0xff]  ;;  %v252_v56 = vld [vmem:[%s1085_s5 + $0x50] sm:$0xff] }
  0x1c   :  { %513 = vmatprep.subr.mxu0 %v56_v36  ;;  %572 = vmatprep.subr.mxu1 %v674_v4  ;;  %v254_v54 = vld [vmem:[%s1085_s5 + $0x60] sm:$0xff]  ;;  %v251_v57 = vld [vmem:[%s1085_s5 + $0x48] sm:$0xff]  ;;  %v249_v59 = vld [vmem:[%s1085_s5 + $0x38] sm:$0xff] }
  0x1d   :  { %514 = vmatpush3.msra.mxu0 %v40_v37  ;;  %573 = vmatpush3.msra.mxu1 %v155_v38  ;;  %v250_v58 = vld [vmem:[%s1085_s5 + $0x40] sm:$0xff]  ;;  %v248_v60 = vld [vmem:[%s1085_s5 + $0x30] sm:$0xff]  ;;  %v247_v61 = vld [vmem:[%s1085_s5 + $0x28] sm:$0xff] }
  0x1e   :  { %515 = vmatprep.subr.mxu0 %v55_v39  ;;  %574 = vmatprep.subr.mxu1 %v674_v4  ;;  %v246_v62 = vld [vmem:[%s1085_s5 + $0x20] sm:$0xff]  ;;  %v245_v63 = vld [vmem:[%s1085_s5 + $0x18] sm:$0xff]  ;;  %v244_v7 = vld [vmem:[%s1085_s5 + $0x10] sm:$0xff] }
  0x1f   :  { %516 = vmatpush3.msra.mxu0 %v39_v40  ;;  %575 = vmatpush3.msra.mxu1 %v154_v41  ;;  %v484_v1 = vld [vmem:[%s1082_s2] ss:$0 sm:$0xff]  ;;  %v243_v8 = vld [vmem:[%s1085_s5 + $0x8] sm:$0xff]  ;;  %v367_v10 = vld [vmem:[%s1087_s7 + $0xf8] sm:$0xff] }
  0x20   :  { %517 = vmatprep.subr.mxu0 %v54_v42  ;;  %576 = vmatprep.subr.mxu1 %v674_v4  ;;  %v242_v9 = vld [vmem:[%s1085_s5] sm:$0xff]  ;;  %v366_v11 = vld [vmem:[%s1087_s7 + $0xf0] sm:$0xff]  ;;  %v365_v12 = vld [vmem:[%s1087_s7 + $0xe8] sm:$0xff] }
  0x21   :  { %518 = vmatpush3.msra.mxu0 %v38_v43  ;;  %577 = vmatpush3.msra.mxu1 %v153_v44  ;;  %v363_v13 = vld [vmem:[%s1087_s7 + $0xd8] sm:$0xff]  ;;  %v362_v14 = vld [vmem:[%s1087_s7 + $0xd0] sm:$0xff]  ;;  %v361_v15 = vld [vmem:[%s1087_s7 + $0xc8] sm:$0xff] }
  0x22   :  { %142 = vmatmul.mubr.f32.vlgmr.msra.gmra.mxu0 %v36_v45  ;;  %578 = vmatprep.subr.mxu1 %v674_v4  ;;  %v360_v16 = vld [vmem:[%s1087_s7 + $0xc0] sm:$0xff]  ;;  %v359_v17 = vld [vmem:[%s1087_s7 + $0xb8] sm:$0xff]  ;;  %v358_v18 = vld [vmem:[%s1087_s7 + $0xb0] sm:$0xff] }
  0x23   :  { %591 = vmatprep.subr.mxu0 %v674_v4  ;;  %579 = vmatpush3.msra.mxu1 %v152_v46  ;;  %v357_v19 = vld [vmem:[%s1087_s7 + $0xa8] sm:$0xff]  ;;  %v356_v20 = vld [vmem:[%s1087_s7 + $0xa0] sm:$0xff]  ;;  %v355_v21 = vld [vmem:[%s1087_s7 + $0x98] sm:$0xff] }
  0x24   :  { %580 = vmatprep.subr.mxu1 %v674_v4  ;;  %588 = vmatprep.mubr.msk.f32.mxu1 %vm675_vm0, %v674_v4  ;;  %v354_v22 = vld [vmem:[%s1087_s7 + $0x90] sm:$0xff]  ;;  %v353_v23 = vld [vmem:[%s1087_s7 + $0x88] sm:$0xff]  ;;  %v352_v24 = vld [vmem:[%s1087_s7 + $0x80] sm:$0xff] }
  0x25   :  { %581 = vmatpush3.msra.mxu1 %v151_v47  ;;  %623 = vmatprep.mubr.msk.f32.mxu0 %vm675_vm0, %v674_v4  ;;  %v351_v25 = vld [vmem:[%s1087_s7 + $0x78] sm:$0xff]  ;;  %v350_v26 = vld [vmem:[%s1087_s7 + $0x70] sm:$0xff]  ;;  %v349_v27 = vld [vmem:[%s1087_s7 + $0x68] sm:$0xff] }
  0x26   :  { %582 = vmatprep.subr.mxu1 %v674_v4  ;;  %592 = vmatpush3.msra.mxu0 %v257_v51  ;;  %v348_v28 = vld [vmem:[%s1087_s7 + $0x60] sm:$0xff]  ;;  %v347_v29 = vld [vmem:[%s1087_s7 + $0x58] sm:$0xff]  ;;  %v346_v30 = vld [vmem:[%s1087_s7 + $0x50] sm:$0xff] }
  0x27   :  { %583 = vmatpush3.msra.mxu1 %v150_v48  ;;  %593 = vmatprep.subr.mxu0 %v674_v4  ;;  %v345_v31 = vld [vmem:[%s1087_s7 + $0x48] sm:$0xff]  ;;  %v344_v32 = vld [vmem:[%s1087_s7 + $0x40] sm:$0xff]  ;;  %v343_v33 = vld [vmem:[%s1087_s7 + $0x38] sm:$0xff] }
  0x28   :  { %584 = vmatprep.subr.mxu1 %v674_v4  ;;  %594 = vmatpush3.msra.mxu0 %v256_v52  ;;  %v342_v34 = vld [vmem:[%s1087_s7 + $0x30] sm:$0xff]  ;;  %v341_v35 = vld [vmem:[%s1087_s7 + $0x28] sm:$0xff]  ;;  %v485_v36 = vld [vmem:[%s1084_s4] ss:$0 sm:$0xff] }
  0x29   :  { %585 = vmatpush3.msra.mxu1 %v149_v49  ;;  %595 = vmatprep.subr.mxu0 %v674_v4  ;;  %v340_v41 = vld [vmem:[%s1087_s7 + $0x20] sm:$0xff]  ;;  %v339_v42 = vld [vmem:[%s1087_s7 + $0x18] sm:$0xff]  ;;  %v338_v43 = vld [vmem:[%s1087_s7 + $0x10] sm:$0xff] }
  0x2a   :  { %586 = vmatprep.subr.mxu1 %v674_v4  ;;  %596 = vmatpush3.msra.mxu0 %v255_v53  ;;  %v337_v44 = vld [vmem:[%s1087_s7 + $0x8] sm:$0xff]  ;;  %v336_v45 = vld [vmem:[%s1087_s7] sm:$0xff] }
  0x2b   :  { %587 = vmatpush3.msra.mxu1 %v148_v50  ;;  %597 = vmatprep.subr.mxu0 %v674_v4  ;;  %v486_v46 = vld [vmem:[%s1086_s6] ss:$0 sm:$0xff] }
  0x2c   :  { %598 = vmatpush3.msra.mxu0 %v254_v54  ;;  %380 = vmatprep.subr.mxu1 %v367_v10 }
  0x2d   :  { %599 = vmatprep.subr.mxu0 %v674_v4 }
  0x2e   :  { %600 = vmatpush3.msra.mxu0 %v253_v55 }
  0x2f   :  { %601 = vmatprep.subr.mxu0 %v674_v4 }
  0x30   :  { %602 = vmatpush3.msra.mxu0 %v252_v56 }
  0x31   :  { %603 = vmatprep.subr.mxu0 %v674_v4 }
  0x32   :  { %604 = vmatpush3.msra.mxu0 %v251_v57 }
  0x33   :  { %605 = vmatprep.subr.mxu0 %v674_v4 }
  0x34   :  { %606 = vmatpush3.msra.mxu0 %v250_v58 }
  0x35   :  { %607 = vmatprep.subr.mxu0 %v674_v4 }
  0x36   :  { %608 = vmatpush3.msra.mxu0 %v249_v59 }
  0x37   :  { %609 = vmatprep.subr.mxu0 %v674_v4 }
  0x38   :  { %610 = vmatpush3.msra.mxu0 %v248_v60 }
  0x39   :  { %611 = vmatprep.subr.mxu0 %v674_v4 }
  0x3a   :  { %612 = vmatpush3.msra.mxu0 %v247_v61 }
  0x3b   :  { %613 = vmatprep.subr.mxu0 %v674_v4 }
  0x3c   :  { %614 = vmatpush3.msra.mxu0 %v246_v62 }
  0x3d   :  { %615 = vmatprep.subr.mxu0 %v674_v4 }
  0x3e   :  { %616 = vmatpush3.msra.mxu0 %v245_v63 }
  0x3f   :  { %617 = vmatprep.subr.mxu0 %v674_v4 }
  0x40   :  { %618 = vmatpush3.msra.mxu0 %v244_v7 }
  0x41   :  { %619 = vmatprep.subr.mxu0 %v674_v4 }
  0x42   :  { %620 = vmatpush3.msra.mxu0 %v243_v8 }
  0x43   :  { %621 = vmatprep.subr.mxu0 %v674_v4 }
  0x44   :  { %622 = vmatpush3.msra.mxu0 %v242_v9 }
  0xe2   :  { %v519_v0 = vpop.f32.mrf.mxu0 }
  0xe4   :  { %v520_v2 = vpop.f32.mrf.mxu0 }
  0xe5   :  { %v521_v3 = vadd.f32 %v520_v2, %v519_v0 }
  0xe7   :  { %v144_v5 = vadd.f32 %v521_v3, %v484_v1 }
  0xe9   :  { %v147_v6 = vmax.f32 %v144_v5, 0.0 }
  0xeb   :  { %589 = vmatmul.mubr.f32.vlgmr.msra.gmra.mxu1 %v147_v6 }
  0xec   :  { %444 = vmatprep.mubr.f32.mxu1 %v674_v4  ;;  %v364_v4 = vld [vmem:[%s1087_s7 + $0xe0] sm:$0xff]  ;;  %381 = vmatpush1.msra.mxu1 %v366_v11 }
  0xed   :  { %382 = vmatprep.subr.mxu1 %v365_v12 }
  0xee   :  { %383 = vmatpush1.msra.mxu1 %v364_v4 }
  0xef   :  { %384 = vmatprep.subr.mxu1 %v363_v13 }
  0xf0   :  { %385 = vmatpush1.msra.mxu1 %v362_v14 }
  0xf1   :  { %386 = vmatprep.subr.mxu1 %v361_v15 }
  0xf2   :  { %387 = vmatpush1.msra.mxu1 %v360_v16 }
  0xf3   :  { %388 = vmatprep.subr.mxu1 %v359_v17 }
  0xf4   :  { %389 = vmatpush1.msra.mxu1 %v358_v18 }
  0xf5   :  { %390 = vmatprep.subr.mxu1 %v357_v19 }
  0xf6   :  { %391 = vmatpush1.msra.mxu1 %v356_v20 }
  0xf7   :  { %392 = vmatprep.subr.mxu1 %v355_v21 }
  0xf8   :  { %393 = vmatpush1.msra.mxu1 %v354_v22 }
  0xf9   :  { %394 = vmatprep.subr.mxu1 %v353_v23 }
  0xfa   :  { %395 = vmatpush1.msra.mxu1 %v352_v24 }
  0xfb   :  { %396 = vmatprep.subr.mxu1 %v351_v25 }
  0xfc   :  { %397 = vmatpush1.msra.mxu1 %v350_v26 }
  0xfd   :  { %398 = vmatprep.subr.mxu1 %v349_v27 }
  0xfe   :  { %399 = vmatpush1.msra.mxu1 %v348_v28 }
  0xff   :  { %400 = vmatprep.subr.mxu1 %v347_v29 }
 0x100   :  { %401 = vmatpush1.msra.mxu1 %v346_v30 }
 0x101   :  { %402 = vmatprep.subr.mxu1 %v345_v31 }
 0x102   :  { %403 = vmatpush1.msra.mxu1 %v344_v32 }
 0x103   :  { %404 = vmatprep.subr.mxu1 %v343_v33 }
 0x104   :  { %405 = vmatpush1.msra.mxu1 %v342_v34 }
 0x105   :  { %406 = vmatprep.subr.mxu1 %v341_v35 }
 0x106   :  { %407 = vmatpush1.msra.mxu1 %v340_v41 }
 0x107   :  { %408 = vmatprep.subr.mxu1 %v339_v42 }
 0x108   :  { %409 = vmatpush1.msra.mxu1 %v338_v43 }
 0x109   :  { %410 = vmatprep.subr.mxu1 %v337_v44 }
 0x10a   :  { %411 = vmatpush1.msra.mxu1 %v336_v45 }
 0x1ab   :  { %v237_v37 = vpop.f32.mrf.mxu1 }
 0x1ac   :  { %v238_v38 = vadd.f32 %v485_v36, %v237_v37 }
 0x1ad   :  { %v590_v39 = vpop.f32.mrf.mxu1 }
 0x1ae   :  { %v241_v40 = vmax.f32 %v238_v38, 0.0 }
 0x1b0   :  { %453 = vst [vmem:[#allocation2] sm:$0xff] %v241_v40  ;;  %624 = vmatmul.mubr.f32.vlgmr.msra.gmra.mxu0 %v241_v40 }
 0x270   :  { %v331_v47 = vpop.f32.mrf.mxu0 }
 0x271   :  { %v332_v48 = vadd.f32 %v486_v46, %v331_v47 }
 0x272   :  { %v625_v49 = vpop.f32.mrf.mxu0 }
 0x273   :  { %v335_v50 = vmax.f32 %v332_v48, 0.0 }
 0x275   :  { %445 = vmatmul.mubr.f32.vlgmr.msra.gmra.mxu1 %v335_v50 }
 0x276   :  { %641 = shalt.err (!%p638_p4)
}
 0x277   :  { %465 = dma.vmem_to_hbm [thread:$0]  %s463_s15, 128, %s1089_s9, [#allocation3]   ;;  %v370_v51 = vlaneseq  ;;  %v368_v54 = vld [vmem:[%s1088_s8] sm:$0x3] }
 0x278   :  { %s677_s18 = smov [#allocation4]  }
 0x279   :  { %v371_v52 = vshrl.u32 %v370_v51, 7  ;;  %s472_s2 = sshll.u32 %s677_s18, 4  ;;  %s473_s2 = int_to_ptr.vmem [resolvable:$true] %s472_s2 }
 0x27a   :  { %s650_s9 = scalar_lea.vmem %s473_s2, 256  ;;  %p655_p6 = scmp.lt.s32.totalorder %s473_s2, %s473_s2 }
 0x27b   :  { %v372_v53 = vsub.s32 0, %v371_v52  ;;  %v376_v55 = vsub.s32 1, %v371_v52  ;;  %p651_p5 = scmp.ne.s32.totalorder %s473_s2, %s650_s9  ;;  %p656_p7 = scmp.lt.s32.totalorder %s650_s9, %s650_s9 }
 0x27d   :  { %v373_v56 = vrot.slane %v368_v54, %v372_v53  ;;  %v377_v57 = vrot.slane %v368_v54, %v376_v55  ;;  %p657_p8 = por %p656_p7, %p655_p6 }
 0x27f   :  { %p658_p9 = pnand %p657_p8, %p651_p5 }
 0x335   :  { %v446_v58 = vpop.f32.mrf.mxu1 }
 0x336   :  { %v447_v59 = vadd.f32 %v446_v58, %v373_v56 }
 0x337   :  { %v448_v60 = vpop.f32.mrf.mxu1 }
 0x338   :  { %v451_v61 = vmax.f32 %v447_v59, 0.0  ;;  %v449_v62 = vadd.f32 %v448_v60, %v377_v57 }
 0x33a   :  { %454 = vst [vmem:[#allocation4] sm:$0xff] %v451_v61  ;;  %v452_v63 = vmax.f32 %v449_v62, 0.0 }
 0x33c   :  { %455 = vst [vmem:[#allocation4 + $0x8] sm:$0xff] %v452_v63 }
 0x33d   :  { %661 = shalt.err (!%p658_p9)
}
 0x33e   :  { %475 = dma.vmem_to_hbm [thread:$0]  %s473_s2, 256, %s1090_s10, [#allocation5]  }
 0x33f   :  { %670 = dma.done.wait [#allocation3], 128  }
 0x340   :  { %671 = vsyncadd [#allocation3], 4294967168 }
 0x341   :  { %672 = dma.done.wait [#allocation5], 256  }
 0x342   :  { %673 = vsyncadd [#allocation5], 4294967040 }
 0x343   :  { %482 = vsyncpa [#allocation3], 1 }
 0x344   :  { %483 = vsyncpa [#allocation5], 1 }

</bundles_post_ra>
